<compile_context>
chip_gen: v5e
topology: v5e:2x2
jax: 0.10.0
libtpu: 0.0.40
codegen_flags: <defaults>
</compile_context>

<pallas_src>
import math
import numpy as np

import jax
import jax.numpy as jnp
from jax import lax
from jax.experimental import pallas as pl
from jax.experimental.pallas import tpu as pltpu


def _round_up(a: int, b: int) -> int:
    return ((a + b - 1) // b) * b


def _cdiv(a: int, b: int) -> int:
    return -(-a // b)


def _lcm(a: int, b: int) -> int:
    return a * b // math.gcd(a, b)


# ----------------------------------------------------------------------------
# Kernel
# ----------------------------------------------------------------------------
def _make_mlp_kernel(num_linear: int, nonlin_first: bool, s_rows: int):
    """Kernel body for a fixed (static) number of linear layers.

    Activation layout inside the kernel is [feature, lane_tile]; weights are
    bf16 [out, in]; biases are f32 [out, 1] and broadcast along lanes.
    """

    def kernel(*refs):
        # refs = (xv, t, w0xv, w0t, b0, w1, b1, ..., o)
        xv_ref, t_ref = refs[0], refs[1]
        o_ref = refs[-1]
        w0xv_ref, w0t_ref, b0_ref = refs[2], refs[3], refs[4]
        rest = refs[5:-1]

        xv = xv_ref[...]                                    # bf16 [S+I, nt]
        if nonlin_first:
            # Softplus only on the x rows (first s_rows sublanes), in f32.
            xv_f = xv.astype(jnp.float32)
            row = lax.broadcasted_iota(jnp.int32, xv_f.shape, 0)
            xv_f = jnp.where(row < s_rows, jax.nn.softplus(xv_f), xv_f)
            xv = xv_f.astype(xv_ref.dtype)

        # First linear layer, concat-free:  h = W0xv@xv + W0t@t + b0
        h = (jnp.dot(w0xv_ref[...], xv, preferred_element_type=jnp.float32)
             + jnp.dot(w0t_ref[...], t_ref[...],
                       preferred_element_type=jnp.float32)
             + b0_ref[...])
        if num_linear > 1:
            h = jax.nn.softplus(h)

        for li in range(1, num_linear):
            w = rest[2 * (li - 1)][...]       # bf16 [out, in]
            b = rest[2 * (li - 1) + 1][...]   # f32  [out, 1]
            h = jnp.dot(w, h.astype(w.dtype),
                        preferred_element_type=jnp.float32) + b
            if li < num_linear - 1:           # final softplus is stripped
                h = jax.nn.softplus(h)

        o_ref[...] = h.astype(o_ref.dtype)

    return kernel


# ----------------------------------------------------------------------------
# Parameter construction (deterministic, mirrors nn.Linear shapes)
# ----------------------------------------------------------------------------
def init_params(key, state_space_size, recurrence_hidden_layers,
                input_size, time_embedding_size):
    all_layer_sizes = list(recurrence_hidden_layers) + [state_space_size]
    total_input_size = state_space_size + time_embedding_size + input_size

    in_sizes = [total_input_size] + all_layer_sizes[:-1]
    out_sizes = all_layer_sizes

    params = []
    for d_in, d_out in zip(in_sizes, out_sizes):
        key, kw, kb = jax.random.split(key, 3)
        scale = 1.0 / np.sqrt(d_in)
        w = jax.random.uniform(kw, (d_in, d_out), jnp.float32, -scale, scale)
        b = jax.random.uniform(kb, (1, d_out), jnp.float32, -scale, scale)
        params.append((w, b))
    return params


# ----------------------------------------------------------------------------
# Wrapper
# ----------------------------------------------------------------------------
def vectoral_residual_forward(x, t_embeddings_schedule, input_vector, params,
                              *, nonlin_first, lane_tile=8192):
    """
    x:                      [..., T, state_space_size]
    t_embeddings_schedule:  [T, time_embedding_size]
    input_vector:           [..., T, input_size]
    returns:                [..., T, state_space_size]  (float32)
    """
    batch_dims = x.shape[:-2]
    T, S = x.shape[-2], x.shape[-1]
    E = t_embeddings_schedule.shape[-1]
    I = input_vector.shape[-1]
    n_batch = int(np.prod(batch_dims)) if batch_dims else 1
    N = n_batch * T

    num_linear = len(params)
    out_dim = params[-1][0].shape[1]          # == state_space_size
    f32 = jnp.float32
    bf16 = jnp.bfloat16

    # --- Lane tile selection (adaptive, keeps nt % T == 0 when cheap) -------
    lane_tile = _round_up(max(int(lane_tile), 128), 128)
    base = _lcm(128, T)
    shared_t = base <= lane_tile              # shared time-embedding pattern
    if not shared_t:
        base = 128
    # >= 2 grid steps for large N so "parallel" can shard across v7x's 2 TCs;
    # otherwise pick the smallest number of near-full tiles.
    num_tiles = max(_cdiv(N, lane_tile), 2 if N >= 2 * base else 1)
    nt = _round_up(_cdiv(N, num_tiles), base)
    N_pad = _round_up(N, nt)
    grid = (N_pad // nt,)

    # --- Pack x & v, single transpose/pad/cast pass (rows-on-lanes) ---------
    xv = jnp.concatenate(
        [x.reshape(N, S), input_vector.reshape(N, I)], axis=-1)    # [N, S+I]
    xvT = jnp.transpose(xv).astype(bf16)                           # [S+I, N]
    if N_pad != N:
        xvT = jnp.pad(xvT, ((0, 0), (0, N_pad - N)))

    # --- Time embedding: flat column j corresponds to time index j % T ------
    t_cols = jnp.transpose(t_embeddings_schedule).astype(bf16)     # [E, T]
    if shared_t:
        # Single [E, nt] pattern reused by every grid step (nt % T == 0): no
        # N-sized broadcast of the schedule ever touches HBM.
        tT = jnp.tile(t_cols, (1, nt // T))
        t_spec = pl.BlockSpec((E, nt), lambda i: (0, 0))
    else:
        # TODO(synk): avoid materializing [E, N_pad] when lcm(128, T) is huge.
        reps = _round_up(N_pad, T) // T
        tT = jnp.tile(t_cols, (1, reps))[:, :N_pad]
        t_spec = pl.BlockSpec((E, nt), lambda i: (0, i))

    # --- Split W0 (concat elimination), pre-transpose weights to [out,in] ---
    w0, b0 = params[0]
    w0xv = jnp.concatenate([w0[:S], w0[S + E:]], axis=0)           # [S+I, h0]
    flat_params = [
        jnp.transpose(w0xv).astype(bf16),                          # [h0, S+I]
        jnp.transpose(w0[S:S + E]).astype(bf16),                   # [h0, E]
        jnp.reshape(b0.astype(f32), (-1, 1)),                      # [h0, 1]
    ]
    for (w, b) in params[1:]:
        flat_params.append(jnp.transpose(w).astype(bf16))          # [out, in]
        flat_params.append(jnp.reshape(b.astype(f32), (-1, 1)))    # [out, 1]

    act_spec = lambda f: pl.BlockSpec((f, nt), lambda i: (0, i))
    full_spec = lambda shp: pl.BlockSpec(shp, lambda i: (0, 0))

    in_specs = [act_spec(S + I), t_spec]
    in_specs += [full_spec(tuple(p.shape)) for p in flat_params]

    # --- Advisory cost estimate ---------------------------------------------
    layer_in = [S + E + I] + [w.shape[0] for (w, _) in params[1:]]
    layer_out = [w.shape[1] for (w, _) in params]
    flops = int(2 * N * sum(di * do for di, do in zip(layer_in, layer_out)))
    sp_elems = (S if nonlin_first else 0) + int(sum(layer_out[:-1]))
    param_bytes = int(sum(int(np.prod(p.shape)) * p.dtype.itemsize
                          for p in flat_params))
    cost = pl.CostEstimate(
        flops=flops,
        transcendentals=int(2 * N * sp_elems),
        bytes_accessed=int(2 * N * (S + I + E) + 4 * N * out_dim + param_bytes),
    )

    kernel = _make_mlp_kernel(num_linear, nonlin_first, S)

    out = pl.pallas_call(
        kernel,
        out_shape=jax.ShapeDtypeStruct((out_dim, N_pad), f32),
        grid_spec=pltpu.PrefetchScalarGridSpec(
            num_scalar_prefetch=0,
            grid=grid,
            in_specs=in_specs,
            out_specs=act_spec(out_dim),
        ),
        compiler_params=pltpu.CompilerParams(
            dimension_semantics=("parallel",)),
        cost_estimate=cost,
    )(xvT, tT, *flat_params)

    # [out_dim, N_pad] -> [..., T, out_dim]
    out = jnp.transpose(out[:, :N]).reshape(*batch_dims, T, out_dim)
    return out


# ----------------------------------------------------------------------------
# Pure-JAX reference (mirrors the PyTorch forward exactly, f32)
# ----------------------------------------------------------------------------
def reference_forward(x, t_sched, input_vector, params, *, nonlin_first):
    if nonlin_first:
        x = jax.nn.softplus(x)
    batch_dims = x.shape[:-2]
    T, E = t_sched.shape
    t_b = jnp.broadcast_to(t_sched, batch_dims + (T, E))
    h = jnp.concatenate([x, t_b, input_vector], axis=-1)
    for li, (w, b) in enumerate(params):
        h = h @ w + b[0]
        if li < len(params) - 1:
            h = jax.nn.softplus(h)
    return h


# ----------------------------------------------------------------------------
# Main
# ----------------------------------------------------------------------------
if __name__ == "__main__":
    # Small, module-consistent shapes.
    state_space_size = 4
    recurrence_hidden_layers = [32, 32]
    input_size = 4
    time_embedding_size = 8
    nonlin_first = True

    batch = 2
    T = 8

    key = jax.random.PRNGKey(0)
    k_p, k_x, k_t, k_v = jax.random.split(key, 4)

    params = init_params(k_p, state_space_size, recurrence_hidden_layers,
                         input_size, time_embedding_size)

    x = jax.random.normal(k_x, (batch, T, state_space_size), jnp.float32)
    t_sched = jax.random.normal(k_t, (T, time_embedding_size), jnp.float32)
    input_vector = jax.random.normal(k_v, (batch, T, input_size), jnp.float32)

    out = vectoral_residual_forward(x, t_sched, input_vector, params,
                                    nonlin_first=nonlin_first)
    out = jax.block_until_ready(out)

    ref = reference_forward(x, t_sched, input_vector, params,
                            nonlin_first=nonlin_first)
    ref = jax.block_until_ready(ref)

    assert out.shape == (batch, T, state_space_size), out.shape
    # bf16 matmul operands with f32 accumulation -> loosened tolerance.
    np.testing.assert_allclose(np.asarray(out), np.asarray(ref),
                               rtol=2e-2, atol=2e-2)
    print("KERNEL_OK")
</pallas_src>

<mosaic_0001>
module attributes {stable_mosaic.version = 11 : i64} {
  func.func @kernel(%arg0: i32, %arg1: memref<8x128xbf16, #tpu.memory_space<vmem>>, %arg2: memref<8x128xbf16, #tpu.memory_space<vmem>>, %arg3: memref<32x8xbf16, #tpu.memory_space<vmem>>, %arg4: memref<32x8xbf16, #tpu.memory_space<vmem>>, %arg5: memref<32x1xf32, #tpu.memory_space<vmem>>, %arg6: memref<32x32xbf16, #tpu.memory_space<vmem>>, %arg7: memref<32x1xf32, #tpu.memory_space<vmem>>, %arg8: memref<4x32xbf16, #tpu.memory_space<vmem>>, %arg9: memref<4x1xf32, #tpu.memory_space<vmem>>, %arg10: memref<4x128xf32, #tpu.memory_space<vmem>>) attributes {dimension_semantics = [#tpu.dimension_semantics<parallel>], iteration_bounds = array<i64: 1>, scalar_prefetch = 0 : i64, scratch_operands = 0 : i64, tpu.core_type = #tpu.core_type<tc>, window_params = [{transform_indices = @transform_0, window_bounds = array<i64: 8, 128>}, {pipeline_mode = #tpu.pipeline_mode<synchronous>, transform_indices = @transform_1, window_bounds = array<i64: 8, 128>}, {pipeline_mode = #tpu.pipeline_mode<synchronous>, transform_indices = @transform_2, window_bounds = array<i64: 32, 8>}, {pipeline_mode = #tpu.pipeline_mode<synchronous>, transform_indices = @transform_3, window_bounds = array<i64: 32, 8>}, {pipeline_mode = #tpu.pipeline_mode<synchronous>, transform_indices = @transform_4, window_bounds = array<i64: 32, 1>}, {pipeline_mode = #tpu.pipeline_mode<synchronous>, transform_indices = @transform_5, window_bounds = array<i64: 32, 32>}, {pipeline_mode = #tpu.pipeline_mode<synchronous>, transform_indices = @transform_6, window_bounds = array<i64: 32, 1>}, {pipeline_mode = #tpu.pipeline_mode<synchronous>, transform_indices = @transform_7, window_bounds = array<i64: 4, 32>}, {pipeline_mode = #tpu.pipeline_mode<synchronous>, transform_indices = @transform_8, window_bounds = array<i64: 4, 1>}, {transform_indices = @transform_9, window_bounds = array<i64: 4, 128>}]} {
    %c0 = arith.constant 0 : index
    %c0_0 = arith.constant 0 : index
    %0 = vector.load %arg1[%c0, %c0_0] : memref<8x128xbf16, #tpu.memory_space<vmem>>, vector<8x128xbf16>
    %1 = arith.extf %0 : vector<8x128xbf16> to vector<8x128xf32>
    %2 = tpu.iota {dimensions = array<i32: 0>} : vector<8x128xi32>
    %c4_i32 = arith.constant 4 : i32
    %3 = vector.broadcast %c4_i32 : i32 to vector<8x128xi32>
    %4 = arith.cmpi slt, %2, %3 : vector<8x128xi32>
    %cst = arith.constant 0.000000e+00 : f32
    %5 = vector.broadcast %cst : f32 to vector<8x128xf32>
    %6 = arith.maximumf %1, %5 : vector<8x128xf32>
    %7 = vector.broadcast %cst : f32 to vector<8x128xf32>
    %8 = arith.subf %1, %7 : vector<8x128xf32>
    %9 = arith.cmpf one, %8, %8 : vector<8x128xf32>
    %10 = vector.broadcast %cst : f32 to vector<8x128xf32>
    %11 = arith.addf %1, %10 : vector<8x128xf32>
    %12 = math.absf %8 : vector<8x128xf32>
    %cst_1 = arith.constant 0.000000e+00 : f32
    %13 = vector.broadcast %cst_1 : f32 to vector<8x128xf32>
    %14 = arith.subf %13, %12 : vector<8x128xf32>
    %15 = math.exp %14 : vector<8x128xf32>
    %16 = math.log1p %15 : vector<8x128xf32>
    %17 = arith.addf %6, %16 : vector<8x128xf32>
    %18 = arith.select %9, %11, %17 : vector<8x128xi1>, vector<8x128xf32>
    %19 = arith.select %4, %18, %1 : vector<8x128xi1>, vector<8x128xf32>
    %20 = arith.truncf %19 : vector<8x128xf32> to vector<8x128xbf16>
    %c0_2 = arith.constant 0 : index
    %c0_3 = arith.constant 0 : index
    %21 = vector.load %arg3[%c0_2, %c0_3] : memref<32x8xbf16, #tpu.memory_space<vmem>>, vector<32x8xbf16>
    %cst_4 = arith.constant dense<0.000000e+00> : vector<32x128xf32>
    %22 = tpu.matmul %21, %20, %cst_4 {dimension_numbers = #tpu.dot_dimension_numbers<[1], [0], [0], [1], [0, 0, 1, 1], [], []>} : vector<32x8xbf16>, vector<8x128xbf16>, vector<32x128xf32> -> vector<32x128xf32>
    %c0_5 = arith.constant 0 : index
    %c0_6 = arith.constant 0 : index
    %23 = vector.load %arg4[%c0_5, %c0_6] : memref<32x8xbf16, #tpu.memory_space<vmem>>, vector<32x8xbf16>
    %c0_7 = arith.constant 0 : index
    %c0_8 = arith.constant 0 : index
    %24 = vector.load %arg2[%c0_7, %c0_8] : memref<8x128xbf16, #tpu.memory_space<vmem>>, vector<8x128xbf16>
    %cst_9 = arith.constant dense<0.000000e+00> : vector<32x128xf32>
    %25 = tpu.matmul %23, %24, %cst_9 {dimension_numbers = #tpu.dot_dimension_numbers<[1], [0], [0], [1], [0, 0, 1, 1], [], []>} : vector<32x8xbf16>, vector<8x128xbf16>, vector<32x128xf32> -> vector<32x128xf32>
    %26 = arith.addf %22, %25 : vector<32x128xf32>
    %c0_10 = arith.constant 0 : index
    %c0_11 = arith.constant 0 : index
    %27 = vector.load %arg5[%c0_10, %c0_11] : memref<32x1xf32, #tpu.memory_space<vmem>>, vector<32x1xf32>
    %28 = vector.broadcast %27 : vector<32x1xf32> to vector<32x128xf32>
    %29 = arith.addf %26, %28 : vector<32x128xf32>
    %cst_12 = arith.constant 0.000000e+00 : f32
    %30 = vector.broadcast %cst_12 : f32 to vector<32x128xf32>
    %31 = arith.maximumf %29, %30 : vector<32x128xf32>
    %32 = vector.broadcast %cst_12 : f32 to vector<32x128xf32>
    %33 = arith.subf %29, %32 : vector<32x128xf32>
    %34 = arith.cmpf one, %33, %33 : vector<32x128xf32>
    %35 = vector.broadcast %cst_12 : f32 to vector<32x128xf32>
    %36 = arith.addf %29, %35 : vector<32x128xf32>
    %37 = math.absf %33 : vector<32x128xf32>
    %cst_13 = arith.constant 0.000000e+00 : f32
    %38 = vector.broadcast %cst_13 : f32 to vector<32x128xf32>
    %39 = arith.subf %38, %37 : vector<32x128xf32>
    %40 = math.exp %39 : vector<32x128xf32>
    %41 = math.log1p %40 : vector<32x128xf32>
    %42 = arith.addf %31, %41 : vector<32x128xf32>
    %43 = arith.select %34, %36, %42 : vector<32x128xi1>, vector<32x128xf32>
    %c0_14 = arith.constant 0 : index
    %c0_15 = arith.constant 0 : index
    %44 = vector.load %arg6[%c0_14, %c0_15] : memref<32x32xbf16, #tpu.memory_space<vmem>>, vector<32x32xbf16>
    %c0_16 = arith.constant 0 : index
    %c0_17 = arith.constant 0 : index
    %45 = vector.load %arg7[%c0_16, %c0_17] : memref<32x1xf32, #tpu.memory_space<vmem>>, vector<32x1xf32>
    %46 = arith.truncf %43 : vector<32x128xf32> to vector<32x128xbf16>
    %cst_18 = arith.constant dense<0.000000e+00> : vector<32x128xf32>
    %47 = tpu.matmul %44, %46, %cst_18 {dimension_numbers = #tpu.dot_dimension_numbers<[1], [0], [0], [1], [0, 0, 1, 1], [], []>} : vector<32x32xbf16>, vector<32x128xbf16>, vector<32x128xf32> -> vector<32x128xf32>
    %48 = vector.broadcast %45 : vector<32x1xf32> to vector<32x128xf32>
    %49 = arith.addf %47, %48 : vector<32x128xf32>
    %cst_19 = arith.constant 0.000000e+00 : f32
    %50 = vector.broadcast %cst_19 : f32 to vector<32x128xf32>
    %51 = arith.maximumf %49, %50 : vector<32x128xf32>
    %52 = vector.broadcast %cst_19 : f32 to vector<32x128xf32>
    %53 = arith.subf %49, %52 : vector<32x128xf32>
    %54 = arith.cmpf one, %53, %53 : vector<32x128xf32>
    %55 = vector.broadcast %cst_19 : f32 to vector<32x128xf32>
    %56 = arith.addf %49, %55 : vector<32x128xf32>
    %57 = math.absf %53 : vector<32x128xf32>
    %cst_20 = arith.constant 0.000000e+00 : f32
    %58 = vector.broadcast %cst_20 : f32 to vector<32x128xf32>
    %59 = arith.subf %58, %57 : vector<32x128xf32>
    %60 = math.exp %59 : vector<32x128xf32>
    %61 = math.log1p %60 : vector<32x128xf32>
    %62 = arith.addf %51, %61 : vector<32x128xf32>
    %63 = arith.select %54, %56, %62 : vector<32x128xi1>, vector<32x128xf32>
    %c0_21 = arith.constant 0 : index
    %c0_22 = arith.constant 0 : index
    %64 = vector.load %arg8[%c0_21, %c0_22] : memref<4x32xbf16, #tpu.memory_space<vmem>>, vector<4x32xbf16>
    %c0_23 = arith.constant 0 : index
    %c0_24 = arith.constant 0 : index
    %65 = vector.load %arg9[%c0_23, %c0_24] : memref<4x1xf32, #tpu.memory_space<vmem>>, vector<4x1xf32>
    %66 = arith.truncf %63 : vector<32x128xf32> to vector<32x128xbf16>
    %cst_25 = arith.constant dense<0.000000e+00> : vector<4x128xf32>
    %67 = tpu.matmul %64, %66, %cst_25 {dimension_numbers = #tpu.dot_dimension_numbers<[1], [0], [0], [1], [0, 0, 1, 1], [], []>} : vector<4x32xbf16>, vector<32x128xbf16>, vector<4x128xf32> -> vector<4x128xf32>
    %68 = vector.broadcast %65 : vector<4x1xf32> to vector<4x128xf32>
    %69 = arith.addf %67, %68 : vector<4x128xf32>
    %c0_26 = arith.constant 0 : index
    %c0_27 = arith.constant 0 : index
    %70 = vector.load %arg10[%c0_26, %c0_27] : memref<4x128xf32, #tpu.memory_space<vmem>>, vector<4x128xf32>
    tpu.vector_store %arg10[%c0_26, %c0_27], %69 {strides = array<i32>} : memref<4x128xf32, #tpu.memory_space<vmem>>, vector<4x128xf32>,
    return
  }
  func.func @transform_0(%arg0: i32) -> (i32, i32) {
    %c0_i32 = arith.constant 0 : i32
    %c0_i32_0 = arith.constant 0 : i32
    return %c0_i32, %arg0 : i32, i32
  }
  func.func @transform_1(%arg0: i32) -> (i32, i32) {
    %c0_i32 = arith.constant 0 : i32
    %c0_i32_0 = arith.constant 0 : i32
    %c0_i32_1 = arith.constant 0 : i32
    return %c0_i32, %c0_i32_0 : i32, i32
  }
  func.func @transform_2(%arg0: i32) -> (i32, i32) {
    %c0_i32 = arith.constant 0 : i32
    %c0_i32_0 = arith.constant 0 : i32
    %c0_i32_1 = arith.constant 0 : i32
    return %c0_i32, %c0_i32_0 : i32, i32
  }
  func.func @transform_3(%arg0: i32) -> (i32, i32) {
    %c0_i32 = arith.constant 0 : i32
    %c0_i32_0 = arith.constant 0 : i32
    %c0_i32_1 = arith.constant 0 : i32
    return %c0_i32, %c0_i32_0 : i32, i32
  }
  func.func @transform_4(%arg0: i32) -> (i32, i32) {
    %c0_i32 = arith.constant 0 : i32
    %c0_i32_0 = arith.constant 0 : i32
    %c0_i32_1 = arith.constant 0 : i32
    return %c0_i32, %c0_i32_0 : i32, i32
  }
  func.func @transform_5(%arg0: i32) -> (i32, i32) {
    %c0_i32 = arith.constant 0 : i32
    %c0_i32_0 = arith.constant 0 : i32
    %c0_i32_1 = arith.constant 0 : i32
    return %c0_i32, %c0_i32_0 : i32, i32
  }
  func.func @transform_6(%arg0: i32) -> (i32, i32) {
    %c0_i32 = arith.constant 0 : i32
    %c0_i32_0 = arith.constant 0 : i32
    %c0_i32_1 = arith.constant 0 : i32
    return %c0_i32, %c0_i32_0 : i32, i32
  }
  func.func @transform_7(%arg0: i32) -> (i32, i32) {
    %c0_i32 = arith.constant 0 : i32
    %c0_i32_0 = arith.constant 0 : i32
    %c0_i32_1 = arith.constant 0 : i32
    return %c0_i32, %c0_i32_0 : i32, i32
  }
  func.func @transform_8(%arg0: i32) -> (i32, i32) {
    %c0_i32 = arith.constant 0 : i32
    %c0_i32_0 = arith.constant 0 : i32
    %c0_i32_1 = arith.constant 0 : i32
    return %c0_i32, %c0_i32_0 : i32, i32
  }
  func.func @transform_9(%arg0: i32) -> (i32, i32) {
    %c0_i32 = arith.constant 0 : i32
    %c0_i32_0 = arith.constant 0 : i32
    return %c0_i32, %arg0 : i32, i32
  }
}

</mosaic_0001>

<bundles_post_ra>
// kernel: tpu_custom_call.1
= control target key start
LH: loop header
LB: loop body
LE: loop exit
PB: predicated region body
PF: predicated region fallthrough
CT: control target
= control target key end

     0   :  { %vm85_vm0 = vcmask 1043456   ;;  %s702_s0 = inlined_call_operand.vmem [shape: bf16[8,128], index: 0, kind: input, shape index: {}]   ;;  %s703_s1 = inlined_call_operand.vmem [shape: bf16[8,128], index: 1, kind: input, shape index: {}]   ;;  %s704_s2 = inlined_call_operand.vmem [shape: bf16[32,8], index: 2, kind: input, shape index: {}]   ;;  %s705_s3 = inlined_call_operand.vmem [shape: bf16[32,8], index: 3, kind: input, shape index: {}]   ;;  %s706_s4 = inlined_call_operand.vmem [shape: f32[32,1], index: 4, kind: input, shape index: {}]   ;;  %s707_s5 = inlined_call_operand.vmem [shape: bf16[32,32], index: 5, kind: input, shape index: {}]   ;;  %s708_s6 = inlined_call_operand.vmem [shape: f32[32,1], index: 6, kind: input, shape index: {}]   ;;  %s709_s7 = inlined_call_operand.vmem [shape: bf16[4,32], index: 7, kind: input, shape index: {}]   ;;  %s710_s8 = inlined_call_operand.vmem [shape: f32[4,1], index: 8, kind: input, shape index: {}]   ;;  %s711_s9 = inlined_call_operand.hbm [shape: f32[4,128], index: 9, kind: output, shape index: {}]  }
   0x1   :  { %v67_v0 = vld [vmem:[%s703_s1] sm:$0xf] }
   0x2   :  { %v87_v1 = vsel %vm85_vm0, %v67_v0, 0  ;;  %v459_v2 = vld [vmem:[%s705_s3] sm:$0xff] }
   0x3   :  { %v34_v3 = vld [vmem:[%s702_s0] sm:$0xf] }
   0x4   :  { %14 = vsyncpa [#allocation3], 0  ;;  %96 = vmatpush.bf16.msra.mxu0 %v87_v1  ;;  %vm78_vm1 = vcmask 64512   ;;  %v35_v4 = vunpack.c.l.bf16 %v34_v3  ;;  %v148_v7 = vld [vmem:[%s706_s4 + $0x10] sm:$0xff]  ;;  %v146_v8 = vld [vmem:[%s706_s4] sm:$0xff]  ;;  %v530_v10 = vmov 0   ;;  %v36_v16 = vlaneseq }
   0x5   :  { %466 = vset.pattern.permute.xlu1 %v530_v10  ;;  %465 = vset.pattern.permute.xlu0 %v530_v10  ;;  %v460_v14 = vld [vmem:[%s705_s3 + $0x8] sm:$0xff]  ;;  %v149_v18 = vld [vmem:[%s706_s4 + $0x18] sm:$0xff]  ;;  %v250_v27 = vld [vmem:[%s708_s6] sm:$0xff]  ;;  %vm286_vm13 = vcmask 261120   ;;  %s531_s15 = smov [#allocation2]   ;;  %s417_s18 = sshll.u32 %s711_s9, 4  ;;  %s418_s18 = int_to_ptr.hbm [resolvable:$true] %s417_s18 }
   0x6   :  { %v42_v5 = vand.u32 2147483647, %v35_v4  ;;  %162 = vperm.xlu0 %465, %v148_v7   ;;  %152 = vperm.xlu1 %466, %v146_v8   ;;  %v147_v19 = vld [vmem:[%s706_s4 + $0x8] sm:$0xff]  ;;  %v37_v22 = vshrl.u32 %v36_v16, 7  ;;  %v39_v23 = vmax.f32 %v35_v4, 0.0  ;;  %vm40_vm3 = vcmp.ne.f32.partialorder %v35_v4, %v35_v4  ;;  %v457_v33 = vld [vmem:[%s704_s2] sm:$0xff] }
   0x7   :  { %434 = vmatmul.msk.bf16.vlgmr.msra.gmra.mxu0 %vm78_vm1, %v459_v2  ;;  %467 = vset.pattern.permute.xlu2 %v530_v10  ;;  %v251_v28 = vld [vmem:[%s708_s6 + $0x8] sm:$0xff]  ;;  %s415_s16 = sshll.u32 %s531_s15, 4  ;;  %s416_s16 = int_to_ptr.vmem [resolvable:$true] %s415_s16 }
   0x8   :  { %v43_v6 = vsub.f32 0.0, %v42_v5  ;;  %vm38_vm4 = vcmp.lt.s32.totalorder %v37_v22, 4  ;;  %v458_v34 = vld [vmem:[%s704_s2 + $0x8] sm:$0xff] }
   0xa   :  { %v44_v9 = vmul.f32 1.442695, %v43_v6 }
   0xc   :  { %468 = vpow2.f32 %v44_v9 }
   0xe   :  { %167 = vperm.xlu0 %465, %v149_v18   ;;  %157 = vperm.xlu1 %466, %v147_v19  }
  0x12   :  { %v469_v11 = vpop.eup %468 }
  0x13   :  { %v46_v12 = vadd.f32 1.0, %v469_v11  ;;  %v49_v13 = vmul.f32 -0.5, %v469_v11  ;;  %v52_v17 = vand.u32 2147483647, %v469_v11 }
  0x15   :  { %470 = vlog2.f32 %v46_v12  ;;  %v50_v15 = vadd.f32 1.0, %v49_v13  ;;  %vm53_vm2 = vcmp.lt.f32.partialorder %v52_v17, 0.0004427343 }
  0x16   :  { %258 = vperm.xlu0 %465, %v250_v27   ;;  %263 = vperm.xlu1 %466, %v251_v28  }
  0x17   :  { %435 = vmatmul.msk.bf16.gmra.mxu0 %vm78_vm1, %v460_v14  ;;  %v51_v20 = vmul.f32 %v469_v11, %v50_v15 }
  0x1b   :  { %v471_v21 = vpop.eup %470 }
  0x1c   :  { %v48_v24 = vmul.f32 0.6931472, %v471_v21 }
  0x1e   :  { %v54_v25 = vsel %vm53_vm2, %v51_v20, %v48_v24 }
  0x1f   :  { %v55_v26 = vadd.f32 %v54_v25, %v39_v23 }
  0x21   :  { %v56_v29 = vsel %vm40_vm3, %v35_v4, %v55_v26 }
  0x22   :  { %v57_v30 = vsel %vm38_vm4, %v56_v29, %v35_v4 }
  0x23   :  { %v58_v31 = vpack.c.bf16 %v57_v30, %v57_v30 }
  0x25   :  { %v125_v32 = vsel %vm85_vm0, %v58_v31, 0 }
  0x26   :  { %134 = vmatpush.bf16.msra.mxu1 %v125_v32 }
  0x29   :  { %444 = vmatmul.msk.bf16.vlgmr.msra.gmra.mxu1 %vm78_vm1, %v457_v33 }
  0x39   :  { %445 = vmatmul.msk.bf16.gmra.mxu1 %vm78_vm1, %v458_v34 }
  0x78   :  { %v153_v36 = vpop.permute.xlu1 %152  ;;  %v163_v48 = vpop.permute.xlu0 %162 }
  0x80   :  { %v158_v41 = vpop.permute.xlu1 %157  ;;  %v168_v62 = vpop.permute.xlu0 %167 }
  0x84   :  { %v98_v35 = vpop.f32.mrf.mxu0 }
  0x8c   :  { %v100_v38 = vpop.f32.mrf.mxu0 }
  0x94   :  { %v103_v47 = vpop.f32.mrf.mxu0 }
  0x9c   :  { %v105_v58 = vpop.f32.mrf.mxu0 }
  0xa6   :  { %v136_v37 = vpop.f32.mrf.mxu1 }
  0xa7   :  { %v137_v39 = vadd.f32 %v136_v37, %v98_v35 }
  0xa9   :  { %v624_v43 = vadd.f32 %v153_v36, %v137_v39  ;;  %v252_v36 = vld [vmem:[%s708_s6 + $0x10] sm:$0xff] }
  0xaa   :  { %268 = vperm.xlu2 %467, %v252_v36  }
  0xab   :  { %v186_v46 = vand.u32 2147483647, %v624_v43  ;;  %vm178_vm12 = vcmp.ne.f32.partialorder %v624_v43, %v624_v43 }
  0xad   :  { %v190_v52 = vsub.f32 0.0, %v186_v46 }
  0xae   :  { %v138_v40 = vpop.f32.mrf.mxu1 }
  0xaf   :  { %v139_v42 = vadd.f32 %v138_v40, %v100_v38  ;;  %v194_v56 = vmul.f32 1.442695, %v190_v52 }
  0xb1   :  { %v626_v44 = vadd.f32 %v158_v41, %v139_v42 }
  0xb3   :  { %v187_v45 = vand.u32 2147483647, %v626_v44  ;;  %v175_v34 = vmax.f32 %v626_v44, 0.0  ;;  %vm179_vm11 = vcmp.ne.f32.partialorder %v626_v44, %v626_v44 }
  0xb5   :  { %v191_v50 = vsub.f32 0.0, %v187_v45 }
  0xb6   :  { %v141_v49 = vpop.f32.mrf.mxu1 }
  0xb7   :  { %v142_v51 = vadd.f32 %v141_v49, %v103_v47  ;;  %v196_v54 = vmul.f32 1.442695, %v191_v50  ;;  %v174_v47 = vmax.f32 %v624_v43, 0.0 }
  0xb9   :  { %v630_v53 = vadd.f32 %v163_v48, %v142_v51  ;;  %472 = vpow2.f32 %v196_v54  ;;  %v253_v54 = vld [vmem:[%s708_s6 + $0x18] sm:$0xff] }
  0xba   :  { %474 = vpow2.f32 %v194_v56  ;;  %273 = vperm.xlu2 %467, %v253_v54  }
  0xbb   :  { %v188_v55 = vand.u32 2147483647, %v630_v53  ;;  %v176_v35 = vmax.f32 %v630_v53, 0.0  ;;  %vm180_vm9 = vcmp.ne.f32.partialorder %v630_v53, %v630_v53 }
  0xbd   :  { %v192_v57 = vsub.f32 0.0, %v188_v55 }
  0xbe   :  { %v143_v59 = vpop.f32.mrf.mxu1 }
  0xbf   :  { %v198_v60 = vmul.f32 1.442695, %v192_v57  ;;  %v144_v61 = vadd.f32 %v143_v59, %v105_v58  ;;  %v473_v1 = vpop.eup %472  ;;  %v461_v58 = vld [vmem:[%s707_s5] sm:$0xff] }
  0xc0   :  { %v475_v3 = vpop.eup %474  ;;  %v211_v7 = vadd.f32 1.0, %v473_v1  ;;  %v214_v11 = vmul.f32 -0.5, %v473_v1  ;;  %v217_v22 = vand.u32 2147483647, %v473_v1  ;;  %v385_v59 = vld [vmem:[%s710_s8] sm:$0xf] }
  0xc1   :  { %476 = vpow2.f32 %v198_v60  ;;  %v173_v63 = vadd.f32 %v168_v62, %v144_v61  ;;  %v202_v8 = vadd.f32 1.0, %v475_v3  ;;  %v205_v16 = vmul.f32 -0.5, %v475_v3  ;;  %v259_v60 = vpop.permute.xlu0 %258  ;;  %v264_v61 = vpop.permute.xlu1 %263 }
  0xc2   :  { %v215_v20 = vadd.f32 1.0, %v214_v11  ;;  %v208_v29 = vand.u32 2147483647, %v475_v3  ;;  %vm218_vm6 = vcmp.lt.f32.partialorder %v217_v22, 0.0004427343  ;;  %390 = vperm.xlu2 %467, %v385_v59  }
  0xc3   :  { %v189_v0 = vand.u32 2147483647, %v173_v63  ;;  %v206_v25 = vadd.f32 1.0, %v205_v16  ;;  %v177_v41 = vmax.f32 %v173_v63, 0.0  ;;  %vm181_vm10 = vcmp.ne.f32.partialorder %v173_v63, %v173_v63 }
  0xc4   :  { %v216_v32 = vmul.f32 %v473_v1, %v215_v20  ;;  %vm209_vm8 = vcmp.lt.f32.partialorder %v208_v29, 0.0004427343 }
  0xc5   :  { %v193_v2 = vsub.f32 0.0, %v189_v0  ;;  %v207_v39 = vmul.f32 %v475_v3, %v206_v25 }
  0xc7   :  { %v477_v4 = vpop.eup %476  ;;  %v200_v5 = vmul.f32 1.442695, %v193_v2 }
  0xc8   :  { %v220_v6 = vadd.f32 1.0, %v477_v4  ;;  %v223_v9 = vmul.f32 -0.5, %v477_v4  ;;  %v226_v18 = vand.u32 2147483647, %v477_v4 }
  0xc9   :  { %478 = vpow2.f32 %v200_v5 }
  0xca   :  { %480 = vlog2.f32 %v220_v6  ;;  %v224_v14 = vadd.f32 1.0, %v223_v9  ;;  %vm633_vm5 = vcmp.lt.f32.partialorder %v226_v18, 0.0004427343 }
  0xcb   :  { %482 = vlog2.f32 %v211_v7 }
  0xcc   :  { %484 = vlog2.f32 %v202_v8  ;;  %v225_v23 = vmul.f32 %v477_v4, %v224_v14 }
  0xcf   :  { %v479_v10 = vpop.eup %478 }
  0xd0   :  { %v481_v12 = vpop.eup %480  ;;  %v229_v13 = vadd.f32 1.0, %v479_v10  ;;  %v232_v15 = vmul.f32 -0.5, %v479_v10  ;;  %v235_v28 = vand.u32 2147483647, %v479_v10 }
  0xd1   :  { %v483_v17 = vpop.eup %482  ;;  %v222_v19 = vmul.f32 0.6931472, %v481_v12 }
  0xd2   :  { %486 = vlog2.f32 %v229_v13  ;;  %v485_v21 = vpop.eup %484  ;;  %v233_v24 = vadd.f32 1.0, %v232_v15  ;;  %v213_v26 = vmul.f32 0.6931472, %v483_v17  ;;  %vm236_vm7 = vcmp.lt.f32.partialorder %v235_v28, 0.0004427343 }
  0xd3   :  { %v228_v30 = vsel %vm633_vm5, %v225_v23, %v222_v19  ;;  %v204_v31 = vmul.f32 0.6931472, %v485_v21 }
  0xd4   :  { %v234_v38 = vmul.f32 %v479_v10, %v233_v24  ;;  %v219_v40 = vsel %vm218_vm6, %v216_v32, %v213_v26  ;;  %v240_v42 = vadd.f32 %v228_v30, %v176_v35 }
  0xd5   :  { %v210_v46 = vsel %vm209_vm8, %v207_v39, %v204_v31  ;;  %v239_v49 = vadd.f32 %v219_v40, %v175_v34 }
  0xd6   :  { %v244_v50 = vsel %vm180_vm9, %v630_v53, %v240_v42  ;;  %v238_v52 = vadd.f32 %v210_v46, %v174_v47 }
  0xd7   :  { %v243_v56 = vsel %vm179_vm11, %v626_v44, %v239_v49  ;;  %v462_v44 = vld [vmem:[%s707_s5 + $0x8] sm:$0xff] }
  0xd8   :  { %v487_v33 = vpop.eup %486  ;;  %v242_v57 = vsel %vm178_vm12, %v624_v43, %v238_v52 }
  0xd9   :  { %v231_v37 = vmul.f32 0.6931472, %v487_v33  ;;  %v254_v53 = vpack.c.bf16 %v243_v56, %v242_v57 }
  0xdb   :  { %v237_v45 = vsel %vm236_vm7, %v234_v38, %v231_v37 }
  0xdc   :  { %v241_v48 = vadd.f32 %v237_v45, %v177_v41 }
  0xde   :  { %v245_v51 = vsel %vm181_vm10, %v173_v63, %v241_v48 }
  0xdf   :  { %v255_v55 = vpack.c.bf16 %v245_v51, %v244_v50 }
  0xe1   :  { %299 = vmatpush.bf16.msra.mxu2 %v255_v55 }
  0xe5   :  { %300 = vmatpush.bf16.msra.mxu2 %v254_v53 }
  0xe8   :  { %454 = vmatmul.msk.bf16.vlgmr.msra.gmra.mxu2 %vm286_vm13, %v461_v58 }
  0xf8   :  { %455 = vmatmul.msk.bf16.gmra.mxu2 %vm286_vm13, %v462_v44 }
 0x104   :  { %v269_v3 = vpop.permute.xlu2 %268 }
 0x114   :  { %v274_v13 = vpop.permute.xlu2 %273 }
 0x16b   :  { %v302_v43 = vpop.f32.mrf.mxu2 }
 0x16c   :  { %v668_v62 = vadd.f32 %v302_v43, %v259_v60 }
 0x16e   :  { %v324_v2 = vand.u32 2147483647, %v668_v62  ;;  %v312_v60 = vmax.f32 %v668_v62, 0.0  ;;  %vm316_vm5 = vcmp.ne.f32.partialorder %v668_v62, %v668_v62 }
 0x170   :  { %v328_v5 = vsub.f32 0.0, %v324_v2 }
 0x172   :  { %v332_v10 = vmul.f32 1.442695, %v328_v5 }
 0x173   :  { %v304_v63 = vpop.f32.mrf.mxu2 }
 0x174   :  { %v670_v0 = vadd.f32 %v304_v63, %v264_v61 }
 0x176   :  { %v325_v1 = vand.u32 2147483647, %v670_v0  ;;  %v313_v52 = vmax.f32 %v670_v0, 0.0  ;;  %vm317_vm4 = vcmp.ne.f32.partialorder %v670_v0, %v670_v0 }
 0x178   :  { %v329_v4 = vsub.f32 0.0, %v325_v1 }
 0x17a   :  { %v334_v8 = vmul.f32 1.442695, %v329_v4 }
 0x17b   :  { %v307_v6 = vpop.f32.mrf.mxu2 }
 0x17c   :  { %v674_v7 = vadd.f32 %v307_v6, %v269_v3  ;;  %488 = vpow2.f32 %v334_v8 }
 0x17d   :  { %490 = vpow2.f32 %v332_v10 }
 0x17e   :  { %v326_v9 = vand.u32 2147483647, %v674_v7  ;;  %v314_v54 = vmax.f32 %v674_v7, 0.0  ;;  %vm318_vm2 = vcmp.ne.f32.partialorder %v674_v7, %v674_v7 }
 0x180   :  { %v330_v11 = vsub.f32 0.0, %v326_v9 }
 0x182   :  { %v336_v12 = vmul.f32 1.442695, %v330_v11  ;;  %v489_v17 = vpop.eup %488 }
 0x183   :  { %v309_v14 = vpop.f32.mrf.mxu2  ;;  %v491_v19 = vpop.eup %490  ;;  %v349_v23 = vadd.f32 1.0, %v489_v17  ;;  %v352_v27 = vmul.f32 -0.5, %v489_v17  ;;  %v355_v38 = vand.u32 2147483647, %v489_v17 }
 0x184   :  { %492 = vpow2.f32 %v336_v12  ;;  %v310_v15 = vadd.f32 %v309_v14, %v274_v13  ;;  %v340_v24 = vadd.f32 1.0, %v491_v19  ;;  %v343_v32 = vmul.f32 -0.5, %v491_v19 }
 0x185   :  { %v353_v36 = vadd.f32 1.0, %v352_v27  ;;  %v346_v47 = vand.u32 2147483647, %v491_v19  ;;  %vm356_vm15 = vcmp.lt.f32.partialorder %v355_v38, 0.0004427343 }
 0x186   :  { %v327_v16 = vand.u32 2147483647, %v310_v15  ;;  %v344_v41 = vadd.f32 1.0, %v343_v32  ;;  %v315_v58 = vmax.f32 %v310_v15, 0.0  ;;  %vm319_vm3 = vcmp.ne.f32.partialorder %v310_v15, %v310_v15 }
 0x187   :  { %v354_v50 = vmul.f32 %v489_v17, %v353_v36  ;;  %vm347_vm1 = vcmp.lt.f32.partialorder %v346_v47, 0.0004427343 }
 0x188   :  { %v331_v18 = vsub.f32 0.0, %v327_v16  ;;  %v345_v57 = vmul.f32 %v491_v19, %v344_v41 }
 0x18a   :  { %v493_v20 = vpop.eup %492  ;;  %v338_v21 = vmul.f32 1.442695, %v331_v18 }
 0x18b   :  { %v358_v22 = vadd.f32 1.0, %v493_v20  ;;  %v361_v25 = vmul.f32 -0.5, %v493_v20  ;;  %v364_v34 = vand.u32 2147483647, %v493_v20 }
 0x18c   :  { %494 = vpow2.f32 %v338_v21 }
 0x18d   :  { %496 = vlog2.f32 %v358_v22  ;;  %v362_v30 = vadd.f32 1.0, %v361_v25  ;;  %vm677_vm14 = vcmp.lt.f32.partialorder %v364_v34, 0.0004427343 }
 0x18e   :  { %498 = vlog2.f32 %v349_v23 }
 0x18f   :  { %500 = vlog2.f32 %v340_v24  ;;  %v363_v39 = vmul.f32 %v493_v20, %v362_v30 }
 0x192   :  { %v495_v26 = vpop.eup %494 }
 0x193   :  { %v497_v28 = vpop.eup %496  ;;  %v367_v29 = vadd.f32 1.0, %v495_v26  ;;  %v370_v31 = vmul.f32 -0.5, %v495_v26  ;;  %v373_v46 = vand.u32 2147483647, %v495_v26 }
 0x194   :  { %v499_v33 = vpop.eup %498  ;;  %v360_v35 = vmul.f32 0.6931472, %v497_v28 }
 0x195   :  { %502 = vlog2.f32 %v367_v29  ;;  %v501_v37 = vpop.eup %500  ;;  %v371_v40 = vadd.f32 1.0, %v370_v31  ;;  %v351_v42 = vmul.f32 0.6931472, %v499_v33  ;;  %vm374_vm0 = vcmp.lt.f32.partialorder %v373_v46, 0.0004427343 }
 0x196   :  { %v366_v48 = vsel %vm677_vm14, %v363_v39, %v360_v35  ;;  %v342_v49 = vmul.f32 0.6931472, %v501_v37 }
 0x197   :  { %v372_v56 = vmul.f32 %v495_v26, %v371_v40  ;;  %v357_v53 = vsel %vm356_vm15, %v354_v50, %v351_v42  ;;  %v378_v59 = vadd.f32 %v366_v48, %v314_v54 }
 0x198   :  { %v348_v43 = vsel %vm347_vm1, %v345_v57, %v342_v49  ;;  %v377_v63 = vadd.f32 %v357_v53, %v313_v52 }
 0x199   :  { %v382_v1 = vsel %vm318_vm2, %v674_v7, %v378_v59  ;;  %v376_v3 = vadd.f32 %v348_v43, %v312_v60  ;;  %v384_v7 = vld [vmem:[%s709_s7] sm:$0x3] }
 0x19a   :  { %v381_v5 = vsel %vm317_vm4, %v670_v0, %v377_v63  ;;  %v391_v0 = vpop.permute.xlu2 %390 }
 0x19b   :  { %v503_v51 = vpop.eup %502  ;;  %v380_v6 = vsel %vm316_vm5, %v668_v62, %v376_v3 }
 0x19c   :  { %v369_v55 = vmul.f32 0.6931472, %v503_v51  ;;  %v386_v8 = vpack.c.bf16 %v381_v5, %v380_v6 }
 0x19e   :  { %v375_v44 = vsel %vm374_vm0, %v372_v56, %v369_v55 }
 0x19f   :  { %v379_v61 = vadd.f32 %v375_v44, %v315_v58 }
 0x1a1   :  { %v383_v2 = vsel %vm319_vm3, %v310_v15, %v379_v61 }
 0x1a2   :  { %v387_v4 = vpack.c.bf16 %v383_v2, %v382_v1 }
 0x1a4   :  { %402 = vmatpush.bf16.msra.mxu3 %v387_v4 }
 0x1a8   :  { %403 = vmatpush.bf16.msra.mxu3 %v386_v8 }
 0x1ab   :  { %456 = vmatmul.msk.bf16.vlgmr.msra.gmra.mxu3 %vm286_vm13, %v384_v7 }
 0x22e   :  { %v405_v9 = vpop.f32.mrf.mxu3 }
 0x22f   :  { %v406_v10 = vadd.f32 %v405_v9, %v391_v0 }
 0x231   :  { %409 = vst [vmem:[#allocation2] sm:$0xf] %v406_v10 }
 0x232   :  { %420 = dma.vmem_to_hbm [thread:$0]  %s416_s16, 64, %s418_s18, [#allocation3]  }
 0x236   :  { %v407_v62 = vpop.f32.mrf.mxu3 }
 0x237   :  { %528 = dma.done.wait [#allocation3], 64  }
 0x238   :  { %529 = vsyncadd [#allocation3], 4294967232 }
 0x239   :  { %425 = vsyncpa [#allocation3], 1 }

</bundles_post_ra>
